<compile_context>
chip_gen: v6e
topology: v6e:2x2x1
jax: 0.10.0
libtpu: 0.0.40
codegen_flags: <defaults>
</compile_context>

<pallas_src>
import dataclasses

import jax
import jax.numpy as jnp
from jax.experimental import pallas as pl
from jax.experimental.pallas import tpu as pltpu


BLOCK_N = 128  # indices per grid step (sublane-dense output tile)


def _round_up(x: int, m: int) -> int:
    return (x + m - 1) // m * m


# ----------------------------------------------------------------------------
# Fused gather kernel: out[i, :] = table[idx[i], :]  via one-hot @ table (MXU)
# ----------------------------------------------------------------------------
def _onehot_gather_kernel(idx_ref, table_ref, out_ref):
    # idx_ref:   (BLOCK_N, 1)          int32 row indices into the fused table
    # table_ref: (vocab_pad, hidden)   whole fused table, VMEM-resident
    # out_ref:   (BLOCK_N, hidden)
    idx = idx_ref[...]                                    # (BLOCK_N, 1)
    block_n = idx.shape[0]
    vocab = table_ref.shape[0]
    col = jax.lax.broadcasted_iota(jnp.int32, (block_n, vocab), 1)
    onehot = (col == idx).astype(table_ref.dtype)         # (BLOCK_N, vocab)
    out_ref[...] = jnp.dot(
        onehot, table_ref[...], preferred_element_type=jnp.float32
    ).astype(out_ref.dtype)


def fused_gather(table: jax.Array, flat_idx: jax.Array) -> jax.Array:
    """Single-pallas_call gather: out[i, :] = table[flat_idx[i], :]."""
    vocab, hidden = table.shape
    n = flat_idx.shape[0]

    # Pad vocab (lane axis of the in-kernel one-hot) to a multiple of 128 and
    # n to a multiple of BLOCK_N so every tile is (8,128)-aligned and output
    # stores are full, unmasked vregs.  Padding is sliced off in the wrapper.
    vocab_pad = _round_up(vocab, 128)
    n_pad = _round_up(max(n, 1), BLOCK_N)

    table_p = jnp.pad(table, ((0, vocab_pad - vocab), (0, 0)))
    idx_p = jnp.pad(flat_idx.astype(jnp.int32), (0, n_pad - n)).reshape(n_pad, 1)

    itemsize = jnp.dtype(table.dtype).itemsize
    cost = pl.CostEstimate(
        flops=2 * n_pad * vocab_pad * hidden,
        transcendentals=0,
        bytes_accessed=(vocab_pad * hidden * itemsize    # table (read once)
                        + n_pad * 4                      # indices
                        + n_pad * hidden * itemsize),    # output
    )

    out = pl.pallas_call(
        _onehot_gather_kernel,
        out_shape=jax.ShapeDtypeStruct((n_pad, hidden), table.dtype),
        grid=(n_pad // BLOCK_N,),
        in_specs=[
            # Per-step block of 128 indices.
            pl.BlockSpec((BLOCK_N, 1), lambda i: (i, 0)),
            # Whole fused table; same block index every step -> stays resident
            # in VMEM (no per-row HBM DMAs).
            pl.BlockSpec((vocab_pad, hidden), lambda i: (0, 0)),
        ],
        out_specs=pl.BlockSpec((BLOCK_N, hidden), lambda i: (i, 0)),
        compiler_params=pltpu.CompilerParams(
            # Index blocks are fully independent -> megacore-shardable on v7x.
            dimension_semantics=("parallel",),
        ),
        cost_estimate=cost,
    )(idx_p, table_p)

    return out[:n]


# ----------------------------------------------------------------------------
# Module-level glue (parameter setup, graph containers, forward)
# ----------------------------------------------------------------------------
@dataclasses.dataclass
class Config:
    max_user_num: int = 64
    max_loc_num: int = 256
    max_geo_num: int = 128
    hidden_size: int = 128


@dataclasses.dataclass
class GraphData:
    x: jax.Array  # node indices before forward; node embeddings after


class EmbeddingLayerPallas:
    def __init__(self, config: Config, key: jax.Array):
        self.config = config
        ku, kl, kg = jax.random.split(key, 3)
        # nn.init.normal_(weight, std=0.1) — overwrites the padding row too.
        self.user_emb = 0.1 * jax.random.normal(
            ku, (config.max_user_num, config.hidden_size), jnp.float32)
        self.loc_emb = 0.1 * jax.random.normal(
            kl, (config.max_loc_num, config.hidden_size), jnp.float32)
        self.geo_emb = 0.1 * jax.random.normal(
            kg, (config.max_geo_num, config.hidden_size), jnp.float32)

        # Fused table + per-table row offsets (built once; 224 KiB f32).
        self.fused_table = jnp.concatenate(
            [self.user_emb, self.loc_emb, self.geo_emb], axis=0)
        self.user_off = 0
        self.loc_off = config.max_user_num
        self.geo_off = config.max_user_num + config.max_loc_num

    def __call__(self, user, traj, geo, long_traj, traj_graph: GraphData,
                 geo_graph: GraphData):
        hidden = self.config.hidden_size

        # (index tensor, offset into fused table) in output order.
        specs = [
            (user, self.user_off),
            (traj, self.loc_off),
            (geo, self.geo_off),
            (long_traj, self.loc_off),
            (traj_graph.x, self.loc_off),
            (geo_graph.x, self.geo_off),
        ]
        flat = [a.reshape(-1).astype(jnp.int32) + off for a, off in specs]
        sizes = [f.shape[0] for f in flat]
        all_idx = jnp.concatenate(flat, axis=0)

        # One fused, blocked gather for all six lookups.
        out = fused_gather(self.fused_table, all_idx)

        results = []
        start = 0
        for (a, _), sz in zip(specs, sizes):
            results.append(out[start:start + sz].reshape(a.shape + (hidden,)))
            start += sz
        user_emb, traj_emb, geo_emb, long_traj_emb, tg_x, gg_x = results

        return (user_emb, traj_emb, geo_emb, long_traj_emb,
                dataclasses.replace(traj_graph, x=tg_x),
                dataclasses.replace(geo_graph, x=gg_x))


# ----------------------------------------------------------------------------
# Demo / correctness check
# ----------------------------------------------------------------------------
if __name__ == "__main__":
    cfg = Config()
    key = jax.random.PRNGKey(0)
    k_params, k_user, k_traj, k_geo, k_long, k_tg, k_gg = jax.random.split(key, 7)

    layer = EmbeddingLayerPallas(cfg, k_params)

    B, S, L = 2, 8, 16          # batch, short-seq, long-seq
    n_traj_nodes, n_geo_nodes = 12, 10

    user = jax.random.randint(k_user, (B,), 0, cfg.max_user_num, jnp.int32)
    traj = jax.random.randint(k_traj, (B, S), 0, cfg.max_loc_num, jnp.int32)
    geo = jax.random.randint(k_geo, (B, S), 0, cfg.max_geo_num, jnp.int32)
    long_traj = jax.random.randint(k_long, (B, L), 0, cfg.max_loc_num, jnp.int32)
    traj_graph = GraphData(
        x=jax.random.randint(k_tg, (n_traj_nodes,), 0, cfg.max_loc_num, jnp.int32))
    geo_graph = GraphData(
        x=jax.random.randint(k_gg, (n_geo_nodes,), 0, cfg.max_geo_num, jnp.int32))

    outs = layer(user, traj, geo, long_traj, traj_graph, geo_graph)
    user_emb, traj_emb, geo_emb, long_traj_emb, tg_out, gg_out = outs
    jax.block_until_ready(
        (user_emb, traj_emb, geo_emb, long_traj_emb, tg_out.x, gg_out.x))

    # Shape checks (match torch.nn.Embedding: indices.shape + (hidden,)).
    assert user_emb.shape == (B, cfg.hidden_size)
    assert traj_emb.shape == (B, S, cfg.hidden_size)
    assert geo_emb.shape == (B, S, cfg.hidden_size)
    assert long_traj_emb.shape == (B, L, cfg.hidden_size)
    assert tg_out.x.shape == (n_traj_nodes, cfg.hidden_size)
    assert gg_out.x.shape == (n_geo_nodes, cfg.hidden_size)

    # Pure-JAX reference check (plain gather, same as nn.Embedding forward).
    assert jnp.allclose(user_emb, layer.user_emb[user])
    assert jnp.allclose(traj_emb, layer.loc_emb[traj])
    assert jnp.allclose(geo_emb, layer.geo_emb[geo])
    assert jnp.allclose(long_traj_emb, layer.loc_emb[long_traj])
    assert jnp.allclose(tg_out.x, layer.loc_emb[traj_graph.x])
    assert jnp.allclose(gg_out.x, layer.geo_emb[geo_graph.x])

    print("KERNEL_OK")
</pallas_src>

<mosaic_0001>
module attributes {stable_mosaic.version = 11 : i64} {
  func.func @_onehot_gather_kernel(%arg0: i32, %arg1: memref<128x1xi32, #tpu.memory_space<vmem>>, %arg2: memref<512x128xf32, #tpu.memory_space<vmem>>, %arg3: memref<128x128xf32, #tpu.memory_space<vmem>>) attributes {dimension_semantics = [#tpu.dimension_semantics<parallel>], iteration_bounds = array<i64: 1>, scalar_prefetch = 0 : i64, scratch_operands = 0 : i64, tpu.core_type = #tpu.core_type<tc>, window_params = [{transform_indices = @transform_0, window_bounds = array<i64: 128, 1>}, {pipeline_mode = #tpu.pipeline_mode<synchronous>, transform_indices = @transform_1, window_bounds = array<i64: 512, 128>}, {transform_indices = @transform_2, window_bounds = array<i64: 128, 128>}]} {
    %c0 = arith.constant 0 : index
    %c0_0 = arith.constant 0 : index
    %0 = vector.load %arg1[%c0, %c0_0] : memref<128x1xi32, #tpu.memory_space<vmem>>, vector<128x1xi32>
    %1 = tpu.iota {dimensions = array<i32: 1>} : vector<128x512xi32>
    %2 = vector.broadcast %0 : vector<128x1xi32> to vector<128x512xi32>
    %3 = arith.cmpi eq, %1, %2 : vector<128x512xi32>
    %4 = arith.extui %3 : vector<128x512xi1> to vector<128x512xi32>
    %5 = arith.sitofp %4 : vector<128x512xi32> to vector<128x512xf32>
    %c0_1 = arith.constant 0 : index
    %c0_2 = arith.constant 0 : index
    %6 = vector.load %arg2[%c0_1, %c0_2] : memref<512x128xf32, #tpu.memory_space<vmem>>, vector<512x128xf32>
    %cst = arith.constant dense<0.000000e+00> : vector<128x128xf32>
    %7 = tpu.matmul %5, %6, %cst {dimension_numbers = #tpu.dot_dimension_numbers<[1], [0], [0], [1], [0, 0, 1, 1], [], []>} : vector<128x512xf32>, vector<512x128xf32>, vector<128x128xf32> -> vector<128x128xf32>
    %c0_3 = arith.constant 0 : index
    %c0_4 = arith.constant 0 : index
    %8 = vector.load %arg3[%c0_3, %c0_4] : memref<128x128xf32, #tpu.memory_space<vmem>>, vector<128x128xf32>
    tpu.vector_store %arg3[%c0_3, %c0_4], %7 {strides = array<i32>} : memref<128x128xf32, #tpu.memory_space<vmem>>, vector<128x128xf32>,
    return
  }
  func.func @transform_0(%arg0: i32) -> (i32, i32) {
    %c0_i32 = arith.constant 0 : i32
    %c0_i32_0 = arith.constant 0 : i32
    return %arg0, %c0_i32 : i32, i32
  }
  func.func @transform_1(%arg0: i32) -> (i32, i32) {
    %c0_i32 = arith.constant 0 : i32
    %c0_i32_0 = arith.constant 0 : i32
    %c0_i32_1 = arith.constant 0 : i32
    return %c0_i32, %c0_i32_0 : i32, i32
  }
  func.func @transform_2(%arg0: i32) -> (i32, i32) {
    %c0_i32 = arith.constant 0 : i32
    %c0_i32_0 = arith.constant 0 : i32
    return %arg0, %c0_i32 : i32, i32
  }
}

</mosaic_0001>

<bundles_post_ra>
// kernel: tpu_custom_call.1
= control target key start
LH: loop header
LB: loop body
LE: loop exit
PB: predicated region body
PF: predicated region fallthrough
CT: control target
= control target key end

     0   :  { %7 = vsyncpa [#allocation3], 0  ;;  %s1234_s0 = inlined_call_operand.vmem [shape: s32[128,1], index: 0, kind: input, shape index: {}]   ;;  %s1235_s1 = inlined_call_operand.hbm [shape: f32[512,128], index: 1, kind: input, shape index: {}]   ;;  %s1236_s2 = inlined_call_operand.hbm [shape: f32[128,128], index: 2, kind: output, shape index: {}]  }
   0x1   :  { %8 = vsyncpa [#allocation4], 0  ;;  %s1014_s9 = smov [#allocation2]  }
   0x2   :  { %s16_s10 = sshll.u32 %s1014_s9, 4  ;;  %s17_s10 = int_to_ptr.vmem [resolvable:$true] %s16_s10 }
   0x3   :  { %s978_s11 = scalar_lea.vmem %s17_s10, 8192  ;;  %p983_p1 = scmp.lt.s32.totalorder %s17_s10, %s17_s10 }
   0x4   :  { %p979_p0 = scmp.ne.s32.totalorder %s17_s10, %s978_s11  ;;  %p984_p2 = scmp.lt.s32.totalorder %s978_s11, %s978_s11 }
   0x6   :  { %p985_p3 = por %p984_p2, %p983_p1 }
   0x8   :  { %p986_p4 = pnand %p985_p3, %p979_p0 }
   0xa   :  { %989 = shalt.err (!%p986_p4)
}
   0xb   :  { %s1015_s12 = smov 128   ;;  %s1016_s13 = smov 8  }
   0xc   :  { %22 = dma.hbm_to_vmem [thread:$0]  %s1235_s1, 8192, %s17_s10, [#allocation3], %s1015_s12, %s1015_s12, %s1016_s13  }
   0xd   :  { %1010 = dma.done.wait [#allocation3], 8192  }
   0xe   :  { %1011 = vsyncadd [#allocation3], 4294959104  ;;  %v1017_v0 = vmov 0   ;;  %v28_v1 = vld [vmem:[%s1234_s0 + $0x10] sm:$0xff]  ;;  %v26_v2 = vld [vmem:[%s1234_s0] sm:$0xff] }
   0xf   :  { %969 = vset.pattern.permute.xlu1 %v1017_v0  ;;  %968 = vset.pattern.permute.xlu0 %v1017_v0  ;;  %v29_v3 = vld [vmem:[%s1234_s0 + $0x18] sm:$0xff]  ;;  %v27_v4 = vld [vmem:[%s1234_s0 + $0x8] sm:$0xff]  ;;  %v30_v6 = vld [vmem:[%s1234_s0 + $0x20] sm:$0xff] }
  0x10   :  { %54 = vperm.xlu1 %969, %v28_v1   ;;  %48 = vperm.xlu0 %968, %v26_v2   ;;  %v31_v5 = vld [vmem:[%s1234_s0 + $0x28] sm:$0xff]  ;;  %v318_v7 = vld [vmem:[#allocation2 + $0xf8] sm:$0xff]  ;;  %v317_v11 = vld [vmem:[#allocation2 + $0xf0] sm:$0xff] }
  0x11   :  { %v350_v8 = vld [vmem:[#allocation2 + $0x1f8] sm:$0xff]  ;;  %802 = vmatprep.subr.mxu0 %v318_v7  ;;  %v349_v12 = vld [vmem:[#allocation2 + $0x1f0] sm:$0xff]  ;;  %v316_v15 = vld [vmem:[#allocation2 + $0xe8] sm:$0xff] }
  0x12   :  { %882 = vmatprep.subr.mxu1 %v350_v8  ;;  %v302_v9 = vld [vmem:[#allocation2 + $0x78] sm:$0xff]  ;;  %v301_v13 = vld [vmem:[#allocation2 + $0x70] sm:$0xff]  ;;  %v348_v16 = vld [vmem:[#allocation2 + $0x1e8] sm:$0xff] }
  0x13   :  { %v334_v10 = vld [vmem:[#allocation2 + $0x178] sm:$0xff]  ;;  %803 = vmatpush3.msra.mxu0 %v302_v9  ;;  %v333_v14 = vld [vmem:[#allocation2 + $0x170] sm:$0xff]  ;;  %v300_v17 = vld [vmem:[#allocation2 + $0x68] sm:$0xff] }
  0x14   :  { %57 = vperm.xlu1 %969, %v29_v3   ;;  %51 = vperm.xlu0 %968, %v27_v4   ;;  %v332_v18 = vld [vmem:[#allocation2 + $0x168] sm:$0xff]  ;;  %v33_v19 = vld [vmem:[%s1234_s0 + $0x38] sm:$0xff]  ;;  %v32_v20 = vld [vmem:[%s1234_s0 + $0x30] sm:$0xff] }
  0x15   :  { %883 = vmatpush3.msra.mxu1 %v334_v10  ;;  %804 = vmatprep.subr.mxu0 %v317_v11  ;;  %v315_v21 = vld [vmem:[#allocation2 + $0xe0] sm:$0xff]  ;;  %v314_v25 = vld [vmem:[#allocation2 + $0xd8] sm:$0xff]  ;;  %v35_v27 = vld [vmem:[%s1234_s0 + $0x48] sm:$0xff] }
  0x16   :  { %884 = vmatprep.subr.mxu1 %v349_v12  ;;  %805 = vmatpush3.msra.mxu0 %v301_v13  ;;  %v347_v22 = vld [vmem:[#allocation2 + $0x1e0] sm:$0xff]  ;;  %v346_v26 = vld [vmem:[#allocation2 + $0x1d8] sm:$0xff]  ;;  %v313_v31 = vld [vmem:[#allocation2 + $0xd0] sm:$0xff] }
  0x17   :  { %885 = vmatpush3.msra.mxu1 %v333_v14  ;;  %806 = vmatprep.subr.mxu0 %v316_v15  ;;  %v299_v23 = vld [vmem:[#allocation2 + $0x60] sm:$0xff]  ;;  %v298_v29 = vld [vmem:[#allocation2 + $0x58] sm:$0xff]  ;;  %v345_v32 = vld [vmem:[#allocation2 + $0x1d0] sm:$0xff] }
  0x18   :  { %63 = vperm.xlu1 %969, %v31_v5   ;;  %60 = vperm.xlu0 %968, %v30_v6   ;;  %v331_v24 = vld [vmem:[#allocation2 + $0x160] sm:$0xff]  ;;  %v330_v30 = vld [vmem:[#allocation2 + $0x158] sm:$0xff]  ;;  %v297_v33 = vld [vmem:[#allocation2 + $0x50] sm:$0xff] }
  0x19   :  { %886 = vmatprep.subr.mxu1 %v348_v16  ;;  %807 = vmatpush3.msra.mxu0 %v300_v17  ;;  %v34_v28 = vld [vmem:[%s1234_s0 + $0x40] sm:$0xff]  ;;  %v329_v34 = vld [vmem:[#allocation2 + $0x150] sm:$0xff]  ;;  %v37_v35 = vld [vmem:[%s1234_s0 + $0x58] sm:$0xff]  ;;  %v42_v17 = vlaneseq }
  0x1a   :  { %887 = vmatpush3.msra.mxu1 %v332_v18  ;;  %808 = vmatprep.subr.mxu0 %v315_v21  ;;  %v36_v36 = vld [vmem:[%s1234_s0 + $0x50] sm:$0xff]  ;;  %v312_v37 = vld [vmem:[#allocation2 + $0xc8] sm:$0xff]  ;;  %v311_v41 = vld [vmem:[#allocation2 + $0xc0] sm:$0xff] }
  0x1b   :  { %888 = vmatprep.subr.mxu1 %v347_v22  ;;  %809 = vmatpush3.msra.mxu0 %v299_v23  ;;  %v344_v38 = vld [vmem:[#allocation2 + $0x1c8] sm:$0xff]  ;;  %v343_v42 = vld [vmem:[#allocation2 + $0x1c0] sm:$0xff]  ;;  %v310_v47 = vld [vmem:[#allocation2 + $0xb8] sm:$0xff]  ;;  %v1089_v18 = vand.u32 127, %v42_v17  ;;  %v1018_v23 = vmov 1.0  }
  0x1c   :  { %69 = vperm.xlu1 %969, %v33_v19   ;;  %66 = vperm.xlu0 %968, %v32_v20   ;;  %v296_v39 = vld [vmem:[#allocation2 + $0x48] sm:$0xff]  ;;  %v38_v44 = vld [vmem:[%s1234_s0 + $0x60] sm:$0xff]  ;;  %v342_v48 = vld [vmem:[#allocation2 + $0x1b8] sm:$0xff] }
  0x1d   :  { %889 = vmatpush3.msra.mxu1 %v331_v24  ;;  %810 = vmatprep.subr.mxu0 %v314_v25  ;;  %v328_v40 = vld [vmem:[#allocation2 + $0x148] sm:$0xff]  ;;  %v295_v45 = vld [vmem:[#allocation2 + $0x40] sm:$0xff]  ;;  %v294_v49 = vld [vmem:[#allocation2 + $0x38] sm:$0xff]  ;;  %v1092_v19 = vadd.s32 128, %v1089_v18  ;;  %v1095_v20 = vadd.s32 384, %v1089_v18  ;;  %v1098_v21 = vadd.s32 256, %v1089_v18 }
  0x1e   :  { %890 = vmatprep.subr.mxu1 %v346_v26  ;;  %811 = vmatpush3.msra.mxu0 %v298_v29  ;;  %v39_v43 = vld [vmem:[%s1234_s0 + $0x68] sm:$0xff]  ;;  %v327_v46 = vld [vmem:[#allocation2 + $0x140] sm:$0xff]  ;;  %v326_v50 = vld [vmem:[#allocation2 + $0x138] sm:$0xff] }
  0x1f   :  { %891 = vmatpush3.msra.mxu1 %v330_v30  ;;  %812 = vmatprep.subr.mxu0 %v313_v31  ;;  %v41_v51 = vld [vmem:[%s1234_s0 + $0x78] sm:$0xff]  ;;  %v40_v52 = vld [vmem:[%s1234_s0 + $0x70] sm:$0xff]  ;;  %v308_v57 = vld [vmem:[#allocation2 + $0xa8] sm:$0xff]  ;;  %s1019_s0 = smov [#allocation5]  }
  0x20   :  { %75 = vperm.xlu1 %969, %v35_v27   ;;  %72 = vperm.xlu0 %968, %v34_v28   ;;  %v309_v53 = vld [vmem:[#allocation2 + $0xb0] sm:$0xff]  ;;  %v340_v58 = vld [vmem:[#allocation2 + $0x1a8] sm:$0xff]  ;;  %v307_v61 = vld [vmem:[#allocation2 + $0xa0] sm:$0xff]  ;;  %s662_s21 = sshll.u32 %s1019_s0, 4  ;;  %s663_s21 = int_to_ptr.vmem [resolvable:$true] %s662_s21 }
  0x21   :  { %892 = vmatprep.subr.mxu1 %v345_v32  ;;  %813 = vmatpush3.msra.mxu0 %v297_v33  ;;  %v341_v54 = vld [vmem:[#allocation2 + $0x1b0] sm:$0xff]  ;;  %v292_v59 = vld [vmem:[#allocation2 + $0x28] sm:$0xff]  ;;  %v339_v62 = vld [vmem:[#allocation2 + $0x1a0] sm:$0xff]  ;;  %s990_s1 = scalar_lea.vmem %s663_s21, 2048  ;;  %p995_p6 = scmp.lt.s32.totalorder %s663_s21, %s663_s21 }
  0x22   :  { %893 = vmatpush3.msra.mxu1 %v329_v34  ;;  %814 = vmatprep.subr.mxu0 %v312_v37  ;;  %v293_v55 = vld [vmem:[#allocation2 + $0x30] sm:$0xff]  ;;  %v324_v60 = vld [vmem:[#allocation2 + $0x128] sm:$0xff]  ;;  %v291_v63 = vld [vmem:[#allocation2 + $0x20] sm:$0xff]  ;;  %p991_p5 = scmp.ne.s32.totalorder %s663_s21, %s990_s1  ;;  %p996_p7 = scmp.lt.s32.totalorder %s990_s1, %s990_s1 }
  0x23   :  { %894 = vmatprep.subr.mxu1 %v344_v38  ;;  %815 = vmatpush3.msra.mxu0 %v296_v39  ;;  %v325_v56 = vld [vmem:[#allocation2 + $0x130] sm:$0xff]  ;;  %v323_v0 = vld [vmem:[#allocation2 + $0x120] sm:$0xff]  ;;  %v306_v1 = vld [vmem:[#allocation2 + $0x98] sm:$0xff] }
  0x24   :  { %81 = vperm.xlu1 %969, %v37_v35   ;;  %78 = vperm.xlu0 %968, %v36_v36   ;;  %v338_v2 = vld [vmem:[#allocation2 + $0x198] sm:$0xff]  ;;  %v305_v5 = vld [vmem:[#allocation2 + $0x90] sm:$0xff]  ;;  %v304_v9 = vld [vmem:[#allocation2 + $0x88] sm:$0xff]  ;;  %p997_p8 = por %p996_p7, %p995_p6 }
  0x25   :  { %895 = vmatpush3.msra.mxu1 %v328_v40  ;;  %816 = vmatprep.subr.mxu0 %v311_v41  ;;  %v290_v3 = vld [vmem:[#allocation2 + $0x18] sm:$0xff]  ;;  %v337_v6 = vld [vmem:[#allocation2 + $0x190] sm:$0xff]  ;;  %v336_v10 = vld [vmem:[#allocation2 + $0x188] sm:$0xff] }
  0x26   :  { %896 = vmatprep.subr.mxu1 %v343_v42  ;;  %817 = vmatpush3.msra.mxu0 %v295_v45  ;;  %v322_v4 = vld [vmem:[#allocation2 + $0x118] sm:$0xff]  ;;  %v289_v7 = vld [vmem:[#allocation2 + $0x10] sm:$0xff]  ;;  %v288_v11 = vld [vmem:[#allocation2 + $0x8] sm:$0xff]  ;;  %p998_p9 = pnand %p997_p8, %p991_p5 }
  0x27   :  { %897 = vmatpush3.msra.mxu1 %v327_v46  ;;  %818 = vmatprep.subr.mxu0 %v310_v47  ;;  %v321_v8 = vld [vmem:[#allocation2 + $0x110] sm:$0xff]  ;;  %v320_v12 = vld [vmem:[#allocation2 + $0x108] sm:$0xff]  ;;  %v303_v13 = vld [vmem:[#allocation2 + $0x80] sm:$0xff] }
  0x28   :  { %87 = vperm.xlu1 %969, %v39_v43   ;;  %84 = vperm.xlu0 %968, %v38_v44   ;;  %v335_v14 = vld [vmem:[#allocation2 + $0x180] sm:$0xff] }
  0x29   :  { %898 = vmatprep.subr.mxu1 %v342_v48  ;;  %819 = vmatpush3.msra.mxu0 %v294_v49  ;;  %v287_v15 = vld [vmem:[#allocation2] sm:$0xff] }
  0x2a   :  { %899 = vmatpush3.msra.mxu1 %v326_v50  ;;  %820 = vmatprep.subr.mxu0 %v309_v53  ;;  %v319_v16 = vld [vmem:[#allocation2 + $0x100] sm:$0xff] }
  0x2b   :  { %900 = vmatprep.subr.mxu1 %v341_v54  ;;  %821 = vmatpush3.msra.mxu0 %v293_v55 }
  0x2c   :  { %93 = vperm.xlu1 %969, %v41_v51   ;;  %90 = vperm.xlu0 %968, %v40_v52  }
  0x2d   :  { %901 = vmatpush3.msra.mxu1 %v325_v56  ;;  %822 = vmatprep.subr.mxu0 %v308_v57 }
  0x2e   :  { %902 = vmatprep.subr.mxu1 %v340_v58  ;;  %823 = vmatpush3.msra.mxu0 %v292_v59 }
  0x2f   :  { %903 = vmatpush3.msra.mxu1 %v324_v60  ;;  %824 = vmatprep.subr.mxu0 %v307_v61 }
  0x30   :  { %904 = vmatprep.subr.mxu1 %v339_v62  ;;  %825 = vmatpush3.msra.mxu0 %v291_v63 }
  0x31   :  { %905 = vmatpush3.msra.mxu1 %v323_v0  ;;  %826 = vmatprep.subr.mxu0 %v306_v1 }
  0x32   :  { %906 = vmatprep.subr.mxu1 %v338_v2  ;;  %827 = vmatpush3.msra.mxu0 %v290_v3 }
  0x33   :  { %907 = vmatpush3.msra.mxu1 %v322_v4  ;;  %828 = vmatprep.subr.mxu0 %v305_v5 }
  0x34   :  { %908 = vmatprep.subr.mxu1 %v337_v6  ;;  %829 = vmatpush3.msra.mxu0 %v289_v7 }
  0x35   :  { %909 = vmatpush3.msra.mxu1 %v321_v8  ;;  %830 = vmatprep.subr.mxu0 %v304_v9 }
  0x36   :  { %910 = vmatprep.subr.mxu1 %v336_v10  ;;  %831 = vmatpush3.msra.mxu0 %v288_v11 }
  0x37   :  { %911 = vmatpush3.msra.mxu1 %v320_v12  ;;  %832 = vmatprep.subr.mxu0 %v303_v13 }
  0x38   :  { %912 = vmatprep.subr.mxu1 %v335_v14  ;;  %833 = vmatpush3.msra.mxu0 %v287_v15 }
  0x39   :  { %913 = vmatpush3.msra.mxu1 %v319_v16 }
  0x8b   :  { %v49_v22 = vpop.permute.xlu0 %48  ;;  %v55_v24 = vpop.permute.xlu1 %54 }
  0x8c   :  { %vm96_vm0 = vcmp.eq.s32.totalorder %v1092_v19, %v49_v22  ;;  %vm98_vm1 = vcmp.eq.s32.totalorder %v1095_v20, %v49_v22  ;;  %vm95_vm2 = vcmp.eq.s32.totalorder %v1089_v18, %v49_v22  ;;  %vm97_vm3 = vcmp.eq.s32.totalorder %v1098_v21, %v49_v22 }
  0x8d   :  { %738 = vmatprep.mubr.msk.f32.mxu0 %vm96_vm0, %v1018_v23  ;;  %770 = vmatprep.mubr.msk.f32.mxu1 %vm98_vm1, %v1018_v23  ;;  %vm104_vm4 = vcmp.eq.s32.totalorder %v1092_v19, %v55_v24  ;;  %vm106_vm5 = vcmp.eq.s32.totalorder %v1095_v20, %v55_v24  ;;  %vm103_vm10 = vcmp.eq.s32.totalorder %v1089_v18, %v55_v24 }
  0x8e   :  { %739 = vmatmul.mubr.msk.f32.vlgmr.msra.gmra.mxu0 %vm95_vm2, %v1018_v23  ;;  %771 = vmatmul.mubr.msk.f32.vlgmr.msra.gmra.mxu1 %vm97_vm3, %v1018_v23  ;;  %vm105_vm11 = vcmp.eq.s32.totalorder %v1098_v21, %v55_v24 }
  0x8f   :  { %v52_v25 = vpop.permute.xlu0 %51  ;;  %v58_v26 = vpop.permute.xlu1 %57 }
  0x90   :  { %vm100_vm6 = vcmp.eq.s32.totalorder %v1092_v19, %v52_v25  ;;  %vm102_vm7 = vcmp.eq.s32.totalorder %v1095_v20, %v52_v25  ;;  %vm99_vm8 = vcmp.eq.s32.totalorder %v1089_v18, %v52_v25  ;;  %vm101_vm9 = vcmp.eq.s32.totalorder %v1098_v21, %v52_v25 }
  0x91   :  { %740 = vmatprep.mubr.msk.f32.mxu0 %vm100_vm6, %v1018_v23  ;;  %772 = vmatprep.mubr.msk.f32.mxu1 %vm102_vm7, %v1018_v23  ;;  %vm108_vm12 = vcmp.eq.s32.totalorder %v1092_v19, %v58_v26  ;;  %vm110_vm13 = vcmp.eq.s32.totalorder %v1095_v20, %v58_v26  ;;  %vm107_vm14 = vcmp.eq.s32.totalorder %v1089_v18, %v58_v26 }
  0x92   :  { %741 = vmatmul.mubr.msk.f32.gmra.mxu0 %vm99_vm8, %v1018_v23  ;;  %773 = vmatmul.mubr.msk.f32.gmra.mxu1 %vm101_vm9, %v1018_v23  ;;  %vm109_vm15 = vcmp.eq.s32.totalorder %v1098_v21, %v58_v26 }
  0x93   :  { %742 = vmatprep.mubr.msk.f32.mxu0 %vm104_vm4, %v1018_v23  ;;  %774 = vmatprep.mubr.msk.f32.mxu1 %vm106_vm5, %v1018_v23  ;;  %v61_v27 = vpop.permute.xlu0 %60  ;;  %v64_v28 = vpop.permute.xlu1 %63 }
  0x94   :  { %vm112_vm0 = vcmp.eq.s32.totalorder %v1092_v19, %v61_v27  ;;  %vm114_vm1 = vcmp.eq.s32.totalorder %v1095_v20, %v61_v27  ;;  %vm111_vm2 = vcmp.eq.s32.totalorder %v1089_v18, %v61_v27  ;;  %vm113_vm3 = vcmp.eq.s32.totalorder %v1098_v21, %v61_v27 }
  0x95   :  { %vm116_vm4 = vcmp.eq.s32.totalorder %v1092_v19, %v64_v28  ;;  %vm118_vm5 = vcmp.eq.s32.totalorder %v1095_v20, %v64_v28  ;;  %vm115_vm6 = vcmp.eq.s32.totalorder %v1089_v18, %v64_v28  ;;  %vm117_vm7 = vcmp.eq.s32.totalorder %v1098_v21, %v64_v28 }
  0x96   :  { %743 = vmatmul.mubr.msk.f32.gmra.mxu0 %vm103_vm10, %v1018_v23  ;;  %775 = vmatmul.mubr.msk.f32.gmra.mxu1 %vm105_vm11, %v1018_v23 }
  0x97   :  { %744 = vmatprep.mubr.msk.f32.mxu0 %vm108_vm12, %v1018_v23  ;;  %776 = vmatprep.mubr.msk.f32.mxu1 %vm110_vm13, %v1018_v23  ;;  %v67_v29 = vpop.permute.xlu0 %66  ;;  %v70_v30 = vpop.permute.xlu1 %69 }
  0x98   :  { %vm120_vm8 = vcmp.eq.s32.totalorder %v1092_v19, %v67_v29  ;;  %vm122_vm9 = vcmp.eq.s32.totalorder %v1095_v20, %v67_v29  ;;  %vm119_vm10 = vcmp.eq.s32.totalorder %v1089_v18, %v67_v29  ;;  %vm121_vm11 = vcmp.eq.s32.totalorder %v1098_v21, %v67_v29 }
  0x99   :  { %vm124_vm12 = vcmp.eq.s32.totalorder %v1092_v19, %v70_v30  ;;  %vm126_vm13 = vcmp.eq.s32.totalorder %v1095_v20, %v70_v30 }
  0x9a   :  { %745 = vmatmul.mubr.msk.f32.gmra.mxu0 %vm107_vm14, %v1018_v23  ;;  %777 = vmatmul.mubr.msk.f32.gmra.mxu1 %vm109_vm15, %v1018_v23  ;;  %vm123_vm14 = vcmp.eq.s32.totalorder %v1089_v18, %v70_v30  ;;  %vm125_vm15 = vcmp.eq.s32.totalorder %v1098_v21, %v70_v30 }
  0x9b   :  { %746 = vmatprep.mubr.msk.f32.mxu0 %vm112_vm0, %v1018_v23  ;;  %778 = vmatprep.mubr.msk.f32.mxu1 %vm114_vm1, %v1018_v23  ;;  %v73_v31 = vpop.permute.xlu0 %72  ;;  %v76_v32 = vpop.permute.xlu1 %75 }
  0x9c   :  { %vm128_vm0 = vcmp.eq.s32.totalorder %v1092_v19, %v73_v31  ;;  %vm130_vm1 = vcmp.eq.s32.totalorder %v1095_v20, %v73_v31 }
  0x9e   :  { %747 = vmatmul.mubr.msk.f32.gmra.mxu0 %vm111_vm2, %v1018_v23  ;;  %779 = vmatmul.mubr.msk.f32.gmra.mxu1 %vm113_vm3, %v1018_v23  ;;  %vm127_vm2 = vcmp.eq.s32.totalorder %v1089_v18, %v73_v31  ;;  %vm129_vm3 = vcmp.eq.s32.totalorder %v1098_v21, %v73_v31 }
  0x9f   :  { %748 = vmatprep.mubr.msk.f32.mxu0 %vm116_vm4, %v1018_v23  ;;  %780 = vmatprep.mubr.msk.f32.mxu1 %vm118_vm5, %v1018_v23  ;;  %vm132_vm4 = vcmp.eq.s32.totalorder %v1092_v19, %v76_v32  ;;  %vm134_vm5 = vcmp.eq.s32.totalorder %v1095_v20, %v76_v32  ;;  %v79_v33 = vpop.permute.xlu0 %78  ;;  %v82_v34 = vpop.permute.xlu1 %81 }
  0xa2   :  { %749 = vmatmul.mubr.msk.f32.gmra.mxu0 %vm115_vm6, %v1018_v23  ;;  %781 = vmatmul.mubr.msk.f32.gmra.mxu1 %vm117_vm7, %v1018_v23  ;;  %vm131_vm6 = vcmp.eq.s32.totalorder %v1089_v18, %v76_v32  ;;  %vm133_vm7 = vcmp.eq.s32.totalorder %v1098_v21, %v76_v32 }
  0xa3   :  { %750 = vmatprep.mubr.msk.f32.mxu0 %vm120_vm8, %v1018_v23  ;;  %782 = vmatprep.mubr.msk.f32.mxu1 %vm122_vm9, %v1018_v23  ;;  %vm136_vm8 = vcmp.eq.s32.totalorder %v1092_v19, %v79_v33  ;;  %vm138_vm9 = vcmp.eq.s32.totalorder %v1095_v20, %v79_v33  ;;  %v85_v35 = vpop.permute.xlu0 %84  ;;  %v88_v36 = vpop.permute.xlu1 %87 }
  0xa6   :  { %751 = vmatmul.mubr.msk.f32.gmra.mxu0 %vm119_vm10, %v1018_v23  ;;  %783 = vmatmul.mubr.msk.f32.gmra.mxu1 %vm121_vm11, %v1018_v23  ;;  %vm135_vm10 = vcmp.eq.s32.totalorder %v1089_v18, %v79_v33  ;;  %vm137_vm11 = vcmp.eq.s32.totalorder %v1098_v21, %v79_v33 }
  0xa7   :  { %752 = vmatprep.mubr.msk.f32.mxu0 %vm124_vm12, %v1018_v23  ;;  %784 = vmatprep.mubr.msk.f32.mxu1 %vm126_vm13, %v1018_v23  ;;  %vm140_vm12 = vcmp.eq.s32.totalorder %v1092_v19, %v82_v34  ;;  %vm142_vm13 = vcmp.eq.s32.totalorder %v1095_v20, %v82_v34  ;;  %v91_v37 = vpop.permute.xlu0 %90  ;;  %v94_v38 = vpop.permute.xlu1 %93 }
  0xaa   :  { %753 = vmatmul.mubr.msk.f32.gmra.mxu0 %vm123_vm14, %v1018_v23  ;;  %785 = vmatmul.mubr.msk.f32.gmra.mxu1 %vm125_vm15, %v1018_v23  ;;  %vm139_vm14 = vcmp.eq.s32.totalorder %v1089_v18, %v82_v34  ;;  %vm141_vm15 = vcmp.eq.s32.totalorder %v1098_v21, %v82_v34 }
  0xab   :  { %754 = vmatprep.mubr.msk.f32.mxu0 %vm128_vm0, %v1018_v23  ;;  %786 = vmatprep.mubr.msk.f32.mxu1 %vm130_vm1, %v1018_v23  ;;  %vm144_vm0 = vcmp.eq.s32.totalorder %v1092_v19, %v85_v35  ;;  %vm146_vm1 = vcmp.eq.s32.totalorder %v1095_v20, %v85_v35 }
  0xae   :  { %755 = vmatmul.mubr.msk.f32.gmra.mxu0 %vm127_vm2, %v1018_v23  ;;  %787 = vmatmul.mubr.msk.f32.gmra.mxu1 %vm129_vm3, %v1018_v23  ;;  %vm143_vm2 = vcmp.eq.s32.totalorder %v1089_v18, %v85_v35  ;;  %vm145_vm3 = vcmp.eq.s32.totalorder %v1098_v21, %v85_v35 }
  0xaf   :  { %756 = vmatprep.mubr.msk.f32.mxu0 %vm132_vm4, %v1018_v23  ;;  %788 = vmatprep.mubr.msk.f32.mxu1 %vm134_vm5, %v1018_v23  ;;  %vm148_vm4 = vcmp.eq.s32.totalorder %v1092_v19, %v88_v36  ;;  %vm150_vm5 = vcmp.eq.s32.totalorder %v1095_v20, %v88_v36 }
  0xb2   :  { %757 = vmatmul.mubr.msk.f32.gmra.mxu0 %vm131_vm6, %v1018_v23  ;;  %789 = vmatmul.mubr.msk.f32.gmra.mxu1 %vm133_vm7, %v1018_v23  ;;  %vm147_vm6 = vcmp.eq.s32.totalorder %v1089_v18, %v88_v36  ;;  %vm149_vm7 = vcmp.eq.s32.totalorder %v1098_v21, %v88_v36 }
  0xb3   :  { %758 = vmatprep.mubr.msk.f32.mxu0 %vm136_vm8, %v1018_v23  ;;  %790 = vmatprep.mubr.msk.f32.mxu1 %vm138_vm9, %v1018_v23  ;;  %vm152_vm8 = vcmp.eq.s32.totalorder %v1092_v19, %v91_v37  ;;  %vm154_vm9 = vcmp.eq.s32.totalorder %v1095_v20, %v91_v37 }
  0xb6   :  { %759 = vmatmul.mubr.msk.f32.gmra.mxu0 %vm135_vm10, %v1018_v23  ;;  %791 = vmatmul.mubr.msk.f32.gmra.mxu1 %vm137_vm11, %v1018_v23  ;;  %vm151_vm10 = vcmp.eq.s32.totalorder %v1089_v18, %v91_v37  ;;  %vm153_vm11 = vcmp.eq.s32.totalorder %v1098_v21, %v91_v37 }
  0xb7   :  { %760 = vmatprep.mubr.msk.f32.mxu0 %vm140_vm12, %v1018_v23  ;;  %792 = vmatprep.mubr.msk.f32.mxu1 %vm142_vm13, %v1018_v23  ;;  %vm156_vm12 = vcmp.eq.s32.totalorder %v1092_v19, %v94_v38  ;;  %vm158_vm13 = vcmp.eq.s32.totalorder %v1095_v20, %v94_v38 }
  0xba   :  { %761 = vmatmul.mubr.msk.f32.gmra.mxu0 %vm139_vm14, %v1018_v23  ;;  %793 = vmatmul.mubr.msk.f32.gmra.mxu1 %vm141_vm15, %v1018_v23  ;;  %vm155_vm14 = vcmp.eq.s32.totalorder %v1089_v18, %v94_v38  ;;  %vm157_vm15 = vcmp.eq.s32.totalorder %v1098_v21, %v94_v38 }
  0xbb   :  { %762 = vmatprep.mubr.msk.f32.mxu0 %vm144_vm0, %v1018_v23  ;;  %794 = vmatprep.mubr.msk.f32.mxu1 %vm146_vm1, %v1018_v23 }
  0xbe   :  { %763 = vmatmul.mubr.msk.f32.gmra.mxu0 %vm143_vm2, %v1018_v23  ;;  %795 = vmatmul.mubr.msk.f32.gmra.mxu1 %vm145_vm3, %v1018_v23 }
  0xbf   :  { %764 = vmatprep.mubr.msk.f32.mxu0 %vm148_vm4, %v1018_v23  ;;  %796 = vmatprep.mubr.msk.f32.mxu1 %vm150_vm5, %v1018_v23 }
  0xc2   :  { %765 = vmatmul.mubr.msk.f32.gmra.mxu0 %vm147_vm6, %v1018_v23  ;;  %797 = vmatmul.mubr.msk.f32.gmra.mxu1 %vm149_vm7, %v1018_v23 }
  0xc3   :  { %766 = vmatprep.mubr.msk.f32.mxu0 %vm152_vm8, %v1018_v23  ;;  %798 = vmatprep.mubr.msk.f32.mxu1 %vm154_vm9, %v1018_v23 }
  0xc6   :  { %767 = vmatmul.mubr.msk.f32.gmra.mxu0 %vm151_vm10, %v1018_v23  ;;  %799 = vmatmul.mubr.msk.f32.gmra.mxu1 %vm153_vm11, %v1018_v23 }
  0xc7   :  { %768 = vmatprep.mubr.msk.f32.mxu0 %vm156_vm12, %v1018_v23  ;;  %800 = vmatprep.mubr.msk.f32.mxu1 %vm158_vm13, %v1018_v23 }
  0xca   :  { %769 = vmatmul.mubr.msk.f32.gmra.mxu0 %vm155_vm14, %v1018_v23  ;;  %801 = vmatmul.mubr.msk.f32.gmra.mxu1 %vm157_vm15, %v1018_v23 }
 0x14e   :  { %v834_v39 = vpop.f32.mrf.mxu0  ;;  %v914_v40 = vpop.f32.mrf.mxu1 }
 0x150   :  { %v835_v41 = vpop.f32.mrf.mxu0  ;;  %v915_v42 = vpop.f32.mrf.mxu1 }
 0x151   :  { %v836_v43 = vadd.f32 %v835_v41, %v834_v39  ;;  %v916_v44 = vadd.f32 %v915_v42, %v914_v40 }
 0x152   :  { %v837_v45 = vpop.f32.mrf.mxu0  ;;  %v917_v46 = vpop.f32.mrf.mxu1 }
 0x153   :  { %v563_v47 = vadd.f32 %v916_v44, %v836_v43 }
 0x154   :  { %v838_v48 = vpop.f32.mrf.mxu0  ;;  %v918_v49 = vpop.f32.mrf.mxu1 }
 0x155   :  { %641 = vst [vmem:[#allocation5] sm:$0xff] %v563_v47  ;;  %v839_v50 = vadd.f32 %v838_v48, %v837_v45  ;;  %v919_v51 = vadd.f32 %v918_v49, %v917_v46 }
 0x156   :  { %v840_v52 = vpop.f32.mrf.mxu0  ;;  %v920_v53 = vpop.f32.mrf.mxu1 }
 0x157   :  { %v568_v54 = vadd.f32 %v919_v51, %v839_v50 }
 0x158   :  { %v841_v55 = vpop.f32.mrf.mxu0  ;;  %v921_v56 = vpop.f32.mrf.mxu1 }
 0x159   :  { %642 = vst [vmem:[#allocation5 + $0x8] sm:$0xff] %v568_v54  ;;  %v842_v57 = vadd.f32 %v841_v55, %v840_v52  ;;  %v922_v58 = vadd.f32 %v921_v56, %v920_v53 }
 0x15a   :  { %v843_v59 = vpop.f32.mrf.mxu0  ;;  %v923_v60 = vpop.f32.mrf.mxu1 }
 0x15b   :  { %v573_v61 = vadd.f32 %v922_v58, %v842_v57 }
 0x15c   :  { %v844_v62 = vpop.f32.mrf.mxu0  ;;  %v924_v63 = vpop.f32.mrf.mxu1 }
 0x15d   :  { %643 = vst [vmem:[#allocation5 + $0x10] sm:$0xff] %v573_v61  ;;  %v845_v0 = vadd.f32 %v844_v62, %v843_v59  ;;  %v925_v1 = vadd.f32 %v924_v63, %v923_v60 }
 0x15e   :  { %v846_v2 = vpop.f32.mrf.mxu0  ;;  %v926_v3 = vpop.f32.mrf.mxu1 }
 0x15f   :  { %v578_v4 = vadd.f32 %v925_v1, %v845_v0 }
 0x160   :  { %v847_v5 = vpop.f32.mrf.mxu0  ;;  %v927_v6 = vpop.f32.mrf.mxu1 }
 0x161   :  { %644 = vst [vmem:[#allocation5 + $0x18] sm:$0xff] %v578_v4  ;;  %v848_v7 = vadd.f32 %v847_v5, %v846_v2  ;;  %v928_v8 = vadd.f32 %v927_v6, %v926_v3 }
 0x162   :  { %v849_v9 = vpop.f32.mrf.mxu0  ;;  %v929_v10 = vpop.f32.mrf.mxu1 }
 0x163   :  { %v583_v11 = vadd.f32 %v928_v8, %v848_v7 }
 0x164   :  { %v850_v12 = vpop.f32.mrf.mxu0  ;;  %v930_v13 = vpop.f32.mrf.mxu1 }
 0x165   :  { %645 = vst [vmem:[#allocation5 + $0x20] sm:$0xff] %v583_v11  ;;  %v851_v14 = vadd.f32 %v850_v12, %v849_v9  ;;  %v931_v15 = vadd.f32 %v930_v13, %v929_v10 }
 0x166   :  { %v852_v16 = vpop.f32.mrf.mxu0  ;;  %v932_v17 = vpop.f32.mrf.mxu1 }
 0x167   :  { %v588_v18 = vadd.f32 %v931_v15, %v851_v14 }
 0x168   :  { %v853_v19 = vpop.f32.mrf.mxu0  ;;  %v933_v20 = vpop.f32.mrf.mxu1 }
 0x169   :  { %646 = vst [vmem:[#allocation5 + $0x28] sm:$0xff] %v588_v18  ;;  %v854_v21 = vadd.f32 %v853_v19, %v852_v16  ;;  %v934_v22 = vadd.f32 %v933_v20, %v932_v17 }
 0x16a   :  { %v855_v23 = vpop.f32.mrf.mxu0  ;;  %v935_v24 = vpop.f32.mrf.mxu1 }
 0x16b   :  { %v593_v25 = vadd.f32 %v934_v22, %v854_v21 }
 0x16c   :  { %v856_v26 = vpop.f32.mrf.mxu0  ;;  %v936_v27 = vpop.f32.mrf.mxu1 }
 0x16d   :  { %647 = vst [vmem:[#allocation5 + $0x30] sm:$0xff] %v593_v25  ;;  %v857_v28 = vadd.f32 %v856_v26, %v855_v23  ;;  %v937_v29 = vadd.f32 %v936_v27, %v935_v24 }
 0x16e   :  { %v858_v30 = vpop.f32.mrf.mxu0  ;;  %v938_v31 = vpop.f32.mrf.mxu1 }
 0x16f   :  { %v598_v32 = vadd.f32 %v937_v29, %v857_v28 }
 0x170   :  { %v859_v33 = vpop.f32.mrf.mxu0  ;;  %v939_v34 = vpop.f32.mrf.mxu1 }
 0x171   :  { %648 = vst [vmem:[#allocation5 + $0x38] sm:$0xff] %v598_v32  ;;  %v860_v35 = vadd.f32 %v859_v33, %v858_v30  ;;  %v940_v36 = vadd.f32 %v939_v34, %v938_v31 }
 0x172   :  { %v861_v37 = vpop.f32.mrf.mxu0  ;;  %v941_v38 = vpop.f32.mrf.mxu1 }
 0x173   :  { %v603_v39 = vadd.f32 %v940_v36, %v860_v35 }
 0x174   :  { %v862_v40 = vpop.f32.mrf.mxu0  ;;  %v942_v41 = vpop.f32.mrf.mxu1 }
 0x175   :  { %649 = vst [vmem:[#allocation5 + $0x40] sm:$0xff] %v603_v39  ;;  %v863_v42 = vadd.f32 %v862_v40, %v861_v37  ;;  %v943_v43 = vadd.f32 %v942_v41, %v941_v38 }
 0x176   :  { %v864_v44 = vpop.f32.mrf.mxu0  ;;  %v944_v45 = vpop.f32.mrf.mxu1 }
 0x177   :  { %v608_v46 = vadd.f32 %v943_v43, %v863_v42 }
 0x178   :  { %v865_v47 = vpop.f32.mrf.mxu0  ;;  %v945_v48 = vpop.f32.mrf.mxu1 }
 0x179   :  { %650 = vst [vmem:[#allocation5 + $0x48] sm:$0xff] %v608_v46  ;;  %v866_v49 = vadd.f32 %v865_v47, %v864_v44  ;;  %v946_v50 = vadd.f32 %v945_v48, %v944_v45 }
 0x17a   :  { %v867_v51 = vpop.f32.mrf.mxu0  ;;  %v947_v52 = vpop.f32.mrf.mxu1 }
 0x17b   :  { %v613_v53 = vadd.f32 %v946_v50, %v866_v49 }
 0x17c   :  { %v868_v54 = vpop.f32.mrf.mxu0  ;;  %v948_v55 = vpop.f32.mrf.mxu1 }
 0x17d   :  { %651 = vst [vmem:[#allocation5 + $0x50] sm:$0xff] %v613_v53  ;;  %v869_v56 = vadd.f32 %v868_v54, %v867_v51  ;;  %v949_v57 = vadd.f32 %v948_v55, %v947_v52 }
 0x17e   :  { %v870_v58 = vpop.f32.mrf.mxu0  ;;  %v950_v59 = vpop.f32.mrf.mxu1 }
 0x17f   :  { %v618_v60 = vadd.f32 %v949_v57, %v869_v56 }
 0x180   :  { %v871_v61 = vpop.f32.mrf.mxu0  ;;  %v951_v62 = vpop.f32.mrf.mxu1 }
 0x181   :  { %652 = vst [vmem:[#allocation5 + $0x58] sm:$0xff] %v618_v60  ;;  %v872_v63 = vadd.f32 %v871_v61, %v870_v58  ;;  %v952_v0 = vadd.f32 %v951_v62, %v950_v59 }
 0x182   :  { %v873_v1 = vpop.f32.mrf.mxu0  ;;  %v953_v2 = vpop.f32.mrf.mxu1 }
 0x183   :  { %v623_v3 = vadd.f32 %v952_v0, %v872_v63 }
 0x184   :  { %v874_v4 = vpop.f32.mrf.mxu0  ;;  %v954_v5 = vpop.f32.mrf.mxu1 }
 0x185   :  { %653 = vst [vmem:[#allocation5 + $0x60] sm:$0xff] %v623_v3  ;;  %v875_v6 = vadd.f32 %v874_v4, %v873_v1  ;;  %v955_v7 = vadd.f32 %v954_v5, %v953_v2 }
 0x186   :  { %v876_v8 = vpop.f32.mrf.mxu0  ;;  %v956_v9 = vpop.f32.mrf.mxu1 }
 0x187   :  { %v628_v10 = vadd.f32 %v955_v7, %v875_v6 }
 0x188   :  { %v877_v11 = vpop.f32.mrf.mxu0  ;;  %v957_v12 = vpop.f32.mrf.mxu1 }
 0x189   :  { %654 = vst [vmem:[#allocation5 + $0x68] sm:$0xff] %v628_v10  ;;  %v878_v13 = vadd.f32 %v877_v11, %v876_v8  ;;  %v958_v14 = vadd.f32 %v957_v12, %v956_v9 }
 0x18a   :  { %v879_v15 = vpop.f32.mrf.mxu0  ;;  %v959_v16 = vpop.f32.mrf.mxu1 }
 0x18b   :  { %v633_v17 = vadd.f32 %v958_v14, %v878_v13 }
 0x18c   :  { %v880_v18 = vpop.f32.mrf.mxu0  ;;  %v960_v19 = vpop.f32.mrf.mxu1 }
 0x18d   :  { %655 = vst [vmem:[#allocation5 + $0x70] sm:$0xff] %v633_v17  ;;  %v881_v20 = vadd.f32 %v880_v18, %v879_v15  ;;  %v961_v21 = vadd.f32 %v960_v19, %v959_v16 }
 0x18f   :  { %v638_v22 = vadd.f32 %v961_v21, %v881_v20 }
 0x191   :  { %656 = vst [vmem:[#allocation5 + $0x78] sm:$0xff] %v638_v22 }
 0x192   :  { %1001 = shalt.err (!%p998_p9)
}
 0x193   :  { %668 = dma.vmem_to_hbm [thread:$0]  %s663_s21, 2048, %s1236_s2, [#allocation4], %s1015_s12, %s1015_s12, %s1016_s13  }
 0x194   :  { %1012 = dma.done.wait [#allocation4], 2048  }
 0x195   :  { %1013 = vsyncadd [#allocation4], 4294965248 }
 0x196   :  { %672 = vsyncpa [#allocation3], 1 }
 0x197   :  { %673 = vsyncpa [#allocation4], 1 }

</bundles_post_ra>
